<compile_context>
chip_gen: v5e
topology: v5e:2x2
jax: 0.10.0
libtpu: 0.0.40
codegen_flags: <defaults>
</compile_context>

<pallas_src>
import functools

import jax
import jax.numpy as jnp
from jax.experimental import pallas as pl
from jax.experimental.pallas import tpu as pltpu


# --------------------------------------------------------------------------- #
# Kernel
# --------------------------------------------------------------------------- #
def deepfm_kernel(dnn_ref, lr_ref, label_ref,
                  wlr_ref, blr_ref,
                  w1_ref, b1_ref, w2_ref, b2_ref, w3_ref, b3_ref,
                  w4_ref, b4_ref,
                  pred_ref, bce_ref,
                  *, num_fields, emb_dim):
    x = dnn_ref[...]                                     # (TB, F*D + Nd) f32

    # ---- FM second-order interaction (from the embedding slice of dnn_in) ----
    tb = x.shape[0]
    sum_emb = jnp.zeros((tb, emb_dim), jnp.float32)
    sum_sq = jnp.zeros((tb, emb_dim), jnp.float32)
    for f in range(num_fields):                          # static unrolled loop
        e = x[:, f * emb_dim:(f + 1) * emb_dim]          # (TB, D)
        sum_emb = sum_emb + e
        sum_sq = sum_sq + e * e
    fm_out = 0.5 * jnp.sum(sum_emb * sum_emb - sum_sq, axis=-1)      # (TB,)

    # ---- LR (first-order) logit: lane reduction, keep the MXU free ----
    lr_logit = jnp.sum(lr_ref[...] * wlr_ref[...], axis=-1) + blr_ref[0, 0]  # (TB,)

    # ---- DNN (MLP 64-64-64-1, relu); last layer as a lane reduction ----
    h = jnp.maximum(jnp.dot(x, w1_ref[...],
                            preferred_element_type=jnp.float32) + b1_ref[...], 0.0)
    h = jnp.maximum(jnp.dot(h, w2_ref[...],
                            preferred_element_type=jnp.float32) + b2_ref[...], 0.0)
    h = jnp.maximum(jnp.dot(h, w3_ref[...],
                            preferred_element_type=jnp.float32) + b3_ref[...], 0.0)
    dnn_out = jnp.sum(h * w4_ref[...], axis=-1) + b4_ref[0, 0]       # (TB,)

    # ---- prediction + per-row BCE (stable logit form) ----
    z = fm_out + lr_logit + dnn_out                                  # (TB,) logits
    pred_ref[0, :] = jax.nn.sigmoid(z)

    y = label_ref[0, :]                                              # (TB,)
    # BCE(sigmoid(z), y) == softplus(z) - y*z == max(z,0) - y*z + log(1+exp(-|z|))
    bce_ref[0, :] = jnp.maximum(z, 0.0) - y * z + jnp.log(1.0 + jnp.exp(-jnp.abs(z)))


# --------------------------------------------------------------------------- #
# Wrapper
# --------------------------------------------------------------------------- #
def deepfm_forward(params, data, sparse_feats, dense_feats, *, embedding_dim,
                   is_training=True, max_tile_b=2048):
    names = list(sparse_feats)
    F = len(names)
    D = embedding_dim
    Nd = len(dense_feats)

    # --- glue: embedding gathers, stack / flatten / concat (plain JAX) ---
    emb = jnp.stack([params["emb"][n][data[n]] for n in names], axis=1)     # (B, F, D)
    B = emb.shape[0]
    lr_sparse = jnp.stack([params["lr_emb"][n][data[n]][:, 0]
                           for n in names], axis=1)                         # (B, F)
    dense = jnp.stack([data[n] for n in dense_feats], axis=1)               # (B, Nd)

    dnn_in = jnp.concatenate([emb.reshape(B, -1), dense], axis=1)           # (B, F*D+Nd)
    lr_in = jnp.concatenate([lr_sparse, dense], axis=1)                     # (B, F+Nd)
    label = data["label"].astype(jnp.float32).reshape(1, B)                 # (1, B) lane-dense

    Din = F * D + Nd
    Dlr = F + Nd
    H = params["w1"].shape[1]

    # Row vectors for the lane-reduction layers.
    wlr_row = params["w_lr"].T.astype(jnp.float32)                          # (1, Dlr)
    w4_row = params["w4"].T.astype(jnp.float32)                             # (1, H)

    # --- tile size: full batch if small, otherwise a lane/sublane-aligned tile ---
    tile_b = B if B <= max_tile_b else max_tile_b                           # max_tile_b % 128 == 0
    grid = (pl.cdiv(B, tile_b),)

    row_spec = lambda width: pl.BlockSpec((tile_b, width), lambda i: (i, 0))
    const_spec = lambda shp: pl.BlockSpec(shp, lambda i: (0, 0))
    lane_spec = pl.BlockSpec((1, tile_b), lambda i: (0, i))

    inputs = (dnn_in, lr_in, label,
              wlr_row, params["b_lr"],
              params["w1"], params["b1"],
              params["w2"], params["b2"],
              params["w3"], params["b3"],
              w4_row, params["b4"])

    in_specs = [
        row_spec(Din),                 # dnn_in
        row_spec(Dlr),                 # lr_in
        lane_spec,                     # label (1, B)
        const_spec((1, Dlr)),          # w_lr row
        const_spec((1, 1)),            # b_lr
        const_spec((Din, H)),          # w1
        const_spec((1, H)),            # b1
        const_spec((H, H)),            # w2
        const_spec((1, H)),            # b2
        const_spec((H, H)),            # w3
        const_spec((1, H)),            # b3
        const_spec((1, H)),            # w4 row
        const_spec((1, 1)),            # b4
    ]

    kernel = functools.partial(deepfm_kernel, num_fields=F, emb_dim=D)

    pred2d, bce2d = pl.pallas_call(
        kernel,
        grid=grid,
        in_specs=in_specs,
        out_specs=(lane_spec, lane_spec),
        out_shape=(jax.ShapeDtypeStruct((1, B), jnp.float32),
                   jax.ShapeDtypeStruct((1, B), jnp.float32)),
        compiler_params=pltpu.CompilerParams(
            dimension_semantics=("parallel",),
            vmem_limit_bytes=32 * 1024 * 1024),
    )(*inputs)

    pred = pred2d.reshape(B, 1)                 # match torch module's (B, 1) output
    if is_training:
        loss = jnp.sum(bce2d) / B               # global mean outside the kernel
        return {"pred": pred, "loss": loss}
    return {"pred": pred}


# --------------------------------------------------------------------------- #
# Pure-JAX reference (mirrors the PyTorch module) for validation
# --------------------------------------------------------------------------- #
def deepfm_reference(params, data, sparse_feats, dense_feats, embedding_dim):
    names = list(sparse_feats)
    emb = jnp.stack([params["emb"][n][data[n]] for n in names], axis=1)
    B = emb.shape[0]
    sum_emb = emb.sum(axis=1)
    fm = 0.5 * jnp.sum(sum_emb ** 2 - (emb ** 2).sum(axis=1), axis=-1, keepdims=True)
    lr_sparse = jnp.stack([params["lr_emb"][n][data[n]][:, 0] for n in names], axis=1)
    dense = jnp.stack([data[n] for n in dense_feats], axis=1)
    lr_in = jnp.concatenate([lr_sparse, dense], axis=1)
    lr_logit = lr_in @ params["w_lr"] + params["b_lr"]
    h = jnp.concatenate([emb.reshape(B, -1), dense], axis=1)
    h = jnp.maximum(h @ params["w1"] + params["b1"], 0.0)
    h = jnp.maximum(h @ params["w2"] + params["b2"], 0.0)
    h = jnp.maximum(h @ params["w3"] + params["b3"], 0.0)
    dnn = h @ params["w4"] + params["b4"]
    pred = jax.nn.sigmoid(fm + lr_logit + dnn)
    y = data["label"].astype(jnp.float32).reshape(B, 1)
    eps = 1e-7
    p = jnp.clip(pred, eps, 1.0 - eps)
    loss = jnp.mean(-(y * jnp.log(p) + (1.0 - y) * jnp.log(1.0 - p)))
    return pred, loss


# --------------------------------------------------------------------------- #
if __name__ == "__main__":
    key = jax.random.PRNGKey(0)
    B = 8
    D = 10                                   # embedding_dim default
    hidden = [64, 64, 64]                    # hidden_units default
    sparse_feats = {"cat_a": 20, "cat_b": 30, "cat_c": 15, "cat_d": 25}
    dense_feats = ["dense_x", "dense_y", "dense_z"]
    F, Nd = len(sparse_feats), len(dense_feats)
    dnn_input_dim = F * D + Nd               # get_dnn_input_dim
    lr_input_dim = F + Nd                    # LR layer input dim

    keys = iter(jax.random.split(key, 64))

    def linear_init(k, fan_in, fan_out):
        k1, k2 = jax.random.split(k)
        lim = 1.0 / float(fan_in) ** 0.5
        w = jax.random.uniform(k1, (fan_in, fan_out), jnp.float32, -lim, lim)
        b = jax.random.uniform(k2, (1, fan_out), jnp.float32, -lim, lim)
        return w, b

    params = {}
    params["emb"] = {n: 0.1 * jax.random.normal(next(keys), (v, D), jnp.float32)
                     for n, v in sparse_feats.items()}
    params["lr_emb"] = {n: 0.1 * jax.random.normal(next(keys), (v, 1), jnp.float32)
                        for n, v in sparse_feats.items()}
    params["w_lr"], params["b_lr"] = linear_init(next(keys), lr_input_dim, 1)
    dims = [dnn_input_dim] + hidden + [1]
    for i in range(4):
        params[f"w{i+1}"], params[f"b{i+1}"] = linear_init(next(keys), dims[i], dims[i + 1])

    data = {}
    for n, v in sparse_feats.items():
        data[n] = jax.random.randint(next(keys), (B,), 0, v)
    for n in dense_feats:
        data[n] = jax.random.normal(next(keys), (B,), jnp.float32)
    data["label"] = jax.random.bernoulli(next(keys), 0.5, (B,)).astype(jnp.float32)

    out = deepfm_forward(params, data, sparse_feats, dense_feats,
                         embedding_dim=D, is_training=True)
    jax.block_until_ready(out["pred"])
    jax.block_until_ready(out["loss"])

    # Validate against the pure-JAX reference of the torch module.
    ref_pred, ref_loss = deepfm_reference(params, data, sparse_feats, dense_feats, D)
    assert jnp.allclose(out["pred"], ref_pred, atol=1e-5, rtol=1e-5), "pred mismatch"
    assert jnp.allclose(out["loss"], ref_loss, atol=1e-5, rtol=1e-5), "loss mismatch"

    print("KERNEL_OK")
</pallas_src>

<mosaic_0001>
module attributes {stable_mosaic.version = 11 : i64} {
  func.func @deepfm_kernel(%arg0: i32, %arg1: memref<8x43xf32, #tpu.memory_space<vmem>>, %arg2: memref<8x7xf32, #tpu.memory_space<vmem>>, %arg3: memref<1x8xf32, #tpu.memory_space<vmem>>, %arg4: memref<1x7xf32, #tpu.memory_space<vmem>>, %arg5: memref<1x1xf32, #tpu.memory_space<vmem>>, %arg6: memref<43x64xf32, #tpu.memory_space<vmem>>, %arg7: memref<1x64xf32, #tpu.memory_space<vmem>>, %arg8: memref<64x64xf32, #tpu.memory_space<vmem>>, %arg9: memref<1x64xf32, #tpu.memory_space<vmem>>, %arg10: memref<64x64xf32, #tpu.memory_space<vmem>>, %arg11: memref<1x64xf32, #tpu.memory_space<vmem>>, %arg12: memref<1x64xf32, #tpu.memory_space<vmem>>, %arg13: memref<1x1xf32, #tpu.memory_space<vmem>>, %arg14: memref<1x8xf32, #tpu.memory_space<vmem>>, %arg15: memref<1x8xf32, #tpu.memory_space<vmem>>) attributes {dimension_semantics = [#tpu.dimension_semantics<parallel>], iteration_bounds = array<i64: 1>, scalar_prefetch = 0 : i64, scratch_operands = 0 : i64, tpu.core_type = #tpu.core_type<tc>, window_params = [{transform_indices = @transform_0, window_bounds = array<i64: 8, 43>}, {transform_indices = @transform_1, window_bounds = array<i64: 8, 7>}, {transform_indices = @transform_2, window_bounds = array<i64: 1, 8>}, {pipeline_mode = #tpu.pipeline_mode<synchronous>, transform_indices = @transform_3, window_bounds = array<i64: 1, 7>}, {pipeline_mode = #tpu.pipeline_mode<synchronous>, transform_indices = @transform_4, window_bounds = array<i64: 1, 1>}, {pipeline_mode = #tpu.pipeline_mode<synchronous>, transform_indices = @transform_5, window_bounds = array<i64: 43, 64>}, {pipeline_mode = #tpu.pipeline_mode<synchronous>, transform_indices = @transform_6, window_bounds = array<i64: 1, 64>}, {pipeline_mode = #tpu.pipeline_mode<synchronous>, transform_indices = @transform_7, window_bounds = array<i64: 64, 64>}, {pipeline_mode = #tpu.pipeline_mode<synchronous>, transform_indices = @transform_8, window_bounds = array<i64: 1, 64>}, {pipeline_mode = #tpu.pipeline_mode<synchronous>, transform_indices = @transform_9, window_bounds = array<i64: 64, 64>}, {pipeline_mode = #tpu.pipeline_mode<synchronous>, transform_indices = @transform_10, window_bounds = array<i64: 1, 64>}, {pipeline_mode = #tpu.pipeline_mode<synchronous>, transform_indices = @transform_11, window_bounds = array<i64: 1, 64>}, {pipeline_mode = #tpu.pipeline_mode<synchronous>, transform_indices = @transform_12, window_bounds = array<i64: 1, 1>}, {transform_indices = @transform_13, window_bounds = array<i64: 1, 8>}, {transform_indices = @transform_14, window_bounds = array<i64: 1, 8>}]} {
    %c0 = arith.constant 0 : index
    %c0_0 = arith.constant 0 : index
    %0 = vector.load %arg1[%c0, %c0_0] : memref<8x43xf32, #tpu.memory_space<vmem>>, vector<8x43xf32>
    %cst = arith.constant 0.000000e+00 : f32
    %1 = vector.broadcast %cst : f32 to vector<8x10xf32>
    %cst_1 = arith.constant 0.000000e+00 : f32
    %2 = vector.broadcast %cst_1 : f32 to vector<8x10xf32>
    %3 = vector.extract_strided_slice %0 {offsets = [0, 0], sizes = [8, 10], strides = [1, 1]} : vector<8x43xf32> to vector<8x10xf32>
    %4 = arith.addf %1, %3 : vector<8x10xf32>
    %5 = arith.mulf %3, %3 : vector<8x10xf32>
    %6 = arith.addf %2, %5 : vector<8x10xf32>
    %7 = vector.extract_strided_slice %0 {offsets = [0, 10], sizes = [8, 10], strides = [1, 1]} : vector<8x43xf32> to vector<8x10xf32>
    %8 = arith.addf %4, %7 : vector<8x10xf32>
    %9 = arith.mulf %7, %7 : vector<8x10xf32>
    %10 = arith.addf %6, %9 : vector<8x10xf32>
    %11 = vector.extract_strided_slice %0 {offsets = [0, 20], sizes = [8, 10], strides = [1, 1]} : vector<8x43xf32> to vector<8x10xf32>
    %12 = arith.addf %8, %11 : vector<8x10xf32>
    %13 = arith.mulf %11, %11 : vector<8x10xf32>
    %14 = arith.addf %10, %13 : vector<8x10xf32>
    %15 = vector.extract_strided_slice %0 {offsets = [0, 30], sizes = [8, 10], strides = [1, 1]} : vector<8x43xf32> to vector<8x10xf32>
    %16 = arith.addf %12, %15 : vector<8x10xf32>
    %17 = arith.mulf %15, %15 : vector<8x10xf32>
    %18 = arith.addf %14, %17 : vector<8x10xf32>
    %19 = arith.mulf %16, %16 : vector<8x10xf32>
    %20 = arith.subf %19, %18 : vector<8x10xf32>
    %cst_2 = arith.constant dense<0.000000e+00> : vector<8xf32>
    %21 = vector.multi_reduction <add>, %20, %cst_2 [1] : vector<8x10xf32> to vector<8xf32>
    %cst_3 = arith.constant 5.000000e-01 : f32
    %22 = vector.broadcast %cst_3 : f32 to vector<8xf32>
    %23 = arith.mulf %22, %21 : vector<8xf32>
    %c0_4 = arith.constant 0 : index
    %c0_5 = arith.constant 0 : index
    %24 = vector.load %arg2[%c0_4, %c0_5] : memref<8x7xf32, #tpu.memory_space<vmem>>, vector<8x7xf32>
    %c0_6 = arith.constant 0 : index
    %c0_7 = arith.constant 0 : index
    %25 = vector.load %arg4[%c0_6, %c0_7] : memref<1x7xf32, #tpu.memory_space<vmem>>, vector<1x7xf32>
    %26 = vector.broadcast %25 : vector<1x7xf32> to vector<8x7xf32>
    %27 = arith.mulf %24, %26 : vector<8x7xf32>
    %cst_8 = arith.constant dense<0.000000e+00> : vector<8xf32>
    %28 = vector.multi_reduction <add>, %27, %cst_8 [1] : vector<8x7xf32> to vector<8xf32>
    %c0_9 = arith.constant 0 : index
    %c0_10 = arith.constant 0 : index
    %29 = vector.load %arg5[%c0_9, %c0_10] : memref<1x1xf32, #tpu.memory_space<vmem>>, vector<1x1xf32>
    %30 = vector.extract %29[0, 0] : f32 from vector<1x1xf32>
    %31 = vector.broadcast %30 : f32 to vector<8xf32>
    %32 = arith.addf %28, %31 : vector<8xf32>
    %c0_11 = arith.constant 0 : index
    %c0_12 = arith.constant 0 : index
    %33 = vector.load %arg6[%c0_11, %c0_12] : memref<43x64xf32, #tpu.memory_space<vmem>>, vector<43x64xf32>
    %cst_13 = arith.constant dense<0.000000e+00> : vector<8x64xf32>
    %34 = tpu.matmul %0, %33, %cst_13 {dimension_numbers = #tpu.dot_dimension_numbers<[1], [0], [0], [1], [0, 0, 1, 1], [], []>} : vector<8x43xf32>, vector<43x64xf32>, vector<8x64xf32> -> vector<8x64xf32>
    %c0_14 = arith.constant 0 : index
    %c0_15 = arith.constant 0 : index
    %35 = vector.load %arg7[%c0_14, %c0_15] : memref<1x64xf32, #tpu.memory_space<vmem>>, vector<1x64xf32>
    %36 = vector.broadcast %35 : vector<1x64xf32> to vector<8x64xf32>
    %37 = arith.addf %34, %36 : vector<8x64xf32>
    %cst_16 = arith.constant 0.000000e+00 : f32
    %38 = vector.broadcast %cst_16 : f32 to vector<8x64xf32>
    %39 = arith.maximumf %37, %38 : vector<8x64xf32>
    %c0_17 = arith.constant 0 : index
    %c0_18 = arith.constant 0 : index
    %40 = vector.load %arg8[%c0_17, %c0_18] : memref<64x64xf32, #tpu.memory_space<vmem>>, vector<64x64xf32>
    %cst_19 = arith.constant dense<0.000000e+00> : vector<8x64xf32>
    %41 = tpu.matmul %39, %40, %cst_19 {dimension_numbers = #tpu.dot_dimension_numbers<[1], [0], [0], [1], [0, 0, 1, 1], [], []>} : vector<8x64xf32>, vector<64x64xf32>, vector<8x64xf32> -> vector<8x64xf32>
    %c0_20 = arith.constant 0 : index
    %c0_21 = arith.constant 0 : index
    %42 = vector.load %arg9[%c0_20, %c0_21] : memref<1x64xf32, #tpu.memory_space<vmem>>, vector<1x64xf32>
    %43 = vector.broadcast %42 : vector<1x64xf32> to vector<8x64xf32>
    %44 = arith.addf %41, %43 : vector<8x64xf32>
    %cst_22 = arith.constant 0.000000e+00 : f32
    %45 = vector.broadcast %cst_22 : f32 to vector<8x64xf32>
    %46 = arith.maximumf %44, %45 : vector<8x64xf32>
    %c0_23 = arith.constant 0 : index
    %c0_24 = arith.constant 0 : index
    %47 = vector.load %arg10[%c0_23, %c0_24] : memref<64x64xf32, #tpu.memory_space<vmem>>, vector<64x64xf32>
    %cst_25 = arith.constant dense<0.000000e+00> : vector<8x64xf32>
    %48 = tpu.matmul %46, %47, %cst_25 {dimension_numbers = #tpu.dot_dimension_numbers<[1], [0], [0], [1], [0, 0, 1, 1], [], []>} : vector<8x64xf32>, vector<64x64xf32>, vector<8x64xf32> -> vector<8x64xf32>
    %c0_26 = arith.constant 0 : index
    %c0_27 = arith.constant 0 : index
    %49 = vector.load %arg11[%c0_26, %c0_27] : memref<1x64xf32, #tpu.memory_space<vmem>>, vector<1x64xf32>
    %50 = vector.broadcast %49 : vector<1x64xf32> to vector<8x64xf32>
    %51 = arith.addf %48, %50 : vector<8x64xf32>
    %cst_28 = arith.constant 0.000000e+00 : f32
    %52 = vector.broadcast %cst_28 : f32 to vector<8x64xf32>
    %53 = arith.maximumf %51, %52 : vector<8x64xf32>
    %c0_29 = arith.constant 0 : index
    %c0_30 = arith.constant 0 : index
    %54 = vector.load %arg12[%c0_29, %c0_30] : memref<1x64xf32, #tpu.memory_space<vmem>>, vector<1x64xf32>
    %55 = vector.broadcast %54 : vector<1x64xf32> to vector<8x64xf32>
    %56 = arith.mulf %53, %55 : vector<8x64xf32>
    %cst_31 = arith.constant dense<0.000000e+00> : vector<8xf32>
    %57 = vector.multi_reduction <add>, %56, %cst_31 [1] : vector<8x64xf32> to vector<8xf32>
    %c0_32 = arith.constant 0 : index
    %c0_33 = arith.constant 0 : index
    %58 = vector.load %arg13[%c0_32, %c0_33] : memref<1x1xf32, #tpu.memory_space<vmem>>, vector<1x1xf32>
    %59 = vector.extract %58[0, 0] : f32 from vector<1x1xf32>
    %60 = vector.broadcast %59 : f32 to vector<8xf32>
    %61 = arith.addf %57, %60 : vector<8xf32>
    %62 = arith.addf %23, %32 : vector<8xf32>
    %63 = arith.addf %62, %61 : vector<8xf32>
    %64 = arith.negf %63 : vector<8xf32>
    %65 = math.exp %64 : vector<8xf32>
    %cst_34 = arith.constant 1.000000e+00 : f32
    %66 = vector.broadcast %cst_34 : f32 to vector<8xf32>
    %67 = arith.addf %66, %65 : vector<8xf32>
    %68 = arith.divf %66, %67 : vector<8xf32>
    %c0_35 = arith.constant 0 : index
    %c0_36 = arith.constant 0 : index
    %69 = vector.load %arg14[%c0_35, %c0_36] : memref<1x8xf32, #tpu.memory_space<vmem>>, vector<1x8xf32>
    %70 = vector.shape_cast %69 : vector<1x8xf32> to vector<8xf32>
    %71 = vector.shape_cast %68 : vector<8xf32> to vector<1x8xf32>
    tpu.vector_store %arg14[%c0_35, %c0_36], %71 {strides = array<i32>} : memref<1x8xf32, #tpu.memory_space<vmem>>, vector<1x8xf32>,
    %c0_37 = arith.constant 0 : index
    %c0_38 = arith.constant 0 : index
    %72 = vector.load %arg3[%c0_37, %c0_38] : memref<1x8xf32, #tpu.memory_space<vmem>>, vector<1x8xf32>
    %73 = vector.shape_cast %72 : vector<1x8xf32> to vector<8xf32>
    %cst_39 = arith.constant 0.000000e+00 : f32
    %74 = vector.broadcast %cst_39 : f32 to vector<8xf32>
    %75 = arith.maximumf %63, %74 : vector<8xf32>
    %76 = arith.mulf %73, %63 : vector<8xf32>
    %77 = arith.subf %75, %76 : vector<8xf32>
    %78 = math.absf %63 : vector<8xf32>
    %cst_40 = arith.constant 0.000000e+00 : f32
    %79 = vector.broadcast %cst_40 : f32 to vector<8xf32>
    %80 = arith.subf %79, %78 : vector<8xf32>
    %81 = math.exp %80 : vector<8xf32>
    %cst_41 = arith.constant 1.000000e+00 : f32
    %82 = vector.broadcast %cst_41 : f32 to vector<8xf32>
    %83 = arith.addf %82, %81 : vector<8xf32>
    %84 = math.log %83 : vector<8xf32>
    %85 = arith.addf %77, %84 : vector<8xf32>
    %c0_42 = arith.constant 0 : index
    %c0_43 = arith.constant 0 : index
    %86 = vector.load %arg15[%c0_42, %c0_43] : memref<1x8xf32, #tpu.memory_space<vmem>>, vector<1x8xf32>
    %87 = vector.shape_cast %86 : vector<1x8xf32> to vector<8xf32>
    %88 = vector.shape_cast %85 : vector<8xf32> to vector<1x8xf32>
    tpu.vector_store %arg15[%c0_42, %c0_43], %88 {strides = array<i32>} : memref<1x8xf32, #tpu.memory_space<vmem>>, vector<1x8xf32>,
    return
  }
  func.func @transform_0(%arg0: i32) -> (i32, i32) {
    %c0_i32 = arith.constant 0 : i32
    %c0_i32_0 = arith.constant 0 : i32
    return %arg0, %c0_i32 : i32, i32
  }
  func.func @transform_1(%arg0: i32) -> (i32, i32) {
    %c0_i32 = arith.constant 0 : i32
    %c0_i32_0 = arith.constant 0 : i32
    return %arg0, %c0_i32 : i32, i32
  }
  func.func @transform_2(%arg0: i32) -> (i32, i32) {
    %c0_i32 = arith.constant 0 : i32
    %c0_i32_0 = arith.constant 0 : i32
    return %c0_i32, %arg0 : i32, i32
  }
  func.func @transform_3(%arg0: i32) -> (i32, i32) {
    %c0_i32 = arith.constant 0 : i32
    %c0_i32_0 = arith.constant 0 : i32
    %c0_i32_1 = arith.constant 0 : i32
    return %c0_i32, %c0_i32_0 : i32, i32
  }
  func.func @transform_4(%arg0: i32) -> (i32, i32) {
    %c0_i32 = arith.constant 0 : i32
    %c0_i32_0 = arith.constant 0 : i32
    %c0_i32_1 = arith.constant 0 : i32
    return %c0_i32, %c0_i32_0 : i32, i32
  }
  func.func @transform_5(%arg0: i32) -> (i32, i32) {
    %c0_i32 = arith.constant 0 : i32
    %c0_i32_0 = arith.constant 0 : i32
    %c0_i32_1 = arith.constant 0 : i32
    return %c0_i32, %c0_i32_0 : i32, i32
  }
  func.func @transform_6(%arg0: i32) -> (i32, i32) {
    %c0_i32 = arith.constant 0 : i32
    %c0_i32_0 = arith.constant 0 : i32
    %c0_i32_1 = arith.constant 0 : i32
    return %c0_i32, %c0_i32_0 : i32, i32
  }
  func.func @transform_7(%arg0: i32) -> (i32, i32) {
    %c0_i32 = arith.constant 0 : i32
    %c0_i32_0 = arith.constant 0 : i32
    %c0_i32_1 = arith.constant 0 : i32
    return %c0_i32, %c0_i32_0 : i32, i32
  }
  func.func @transform_8(%arg0: i32) -> (i32, i32) {
    %c0_i32 = arith.constant 0 : i32
    %c0_i32_0 = arith.constant 0 : i32
    %c0_i32_1 = arith.constant 0 : i32
    return %c0_i32, %c0_i32_0 : i32, i32
  }
  func.func @transform_9(%arg0: i32) -> (i32, i32) {
    %c0_i32 = arith.constant 0 : i32
    %c0_i32_0 = arith.constant 0 : i32
    %c0_i32_1 = arith.constant 0 : i32
    return %c0_i32, %c0_i32_0 : i32, i32
  }
  func.func @transform_10(%arg0: i32) -> (i32, i32) {
    %c0_i32 = arith.constant 0 : i32
    %c0_i32_0 = arith.constant 0 : i32
    %c0_i32_1 = arith.constant 0 : i32
    return %c0_i32, %c0_i32_0 : i32, i32
  }
  func.func @transform_11(%arg0: i32) -> (i32, i32) {
    %c0_i32 = arith.constant 0 : i32
    %c0_i32_0 = arith.constant 0 : i32
    %c0_i32_1 = arith.constant 0 : i32
    return %c0_i32, %c0_i32_0 : i32, i32
  }
  func.func @transform_12(%arg0: i32) -> (i32, i32) {
    %c0_i32 = arith.constant 0 : i32
    %c0_i32_0 = arith.constant 0 : i32
    %c0_i32_1 = arith.constant 0 : i32
    return %c0_i32, %c0_i32_0 : i32, i32
  }
  func.func @transform_13(%arg0: i32) -> (i32, i32) {
    %c0_i32 = arith.constant 0 : i32
    %c0_i32_0 = arith.constant 0 : i32
    return %c0_i32, %arg0 : i32, i32
  }
  func.func @transform_14(%arg0: i32) -> (i32, i32) {
    %c0_i32 = arith.constant 0 : i32
    %c0_i32_0 = arith.constant 0 : i32
    return %c0_i32, %arg0 : i32, i32
  }
}

</mosaic_0001>

<bundles_post_ra>
// kernel: tpu_custom_call.1
= control target key start
LH: loop header
LB: loop body
LE: loop exit
PB: predicated region body
PF: predicated region fallthrough
CT: control target
= control target key end

     0   :  { %s792_s0 = inlined_call_operand.hbm [shape: f32[8,43], index: 0, kind: input, shape index: {}]   ;;  %s793_s1 = inlined_call_operand.hbm [shape: f32[8,7], index: 1, kind: input, shape index: {}]   ;;  %s794_s2 = inlined_call_operand.vmem [shape: f32[1,8], index: 2, kind: input, shape index: {}]   ;;  %s795_s3 = inlined_call_operand.vmem [shape: f32[1,7], index: 3, kind: input, shape index: {}]   ;;  %s796_s4 = inlined_call_operand.<no memory space> [shape: f32[1,1], index: 4, kind: input, shape index: {}]   ;;  %s797_s5 = inlined_call_operand.hbm [shape: f32[43,64], index: 5, kind: input, shape index: {}]   ;;  %s798_s6 = inlined_call_operand.vmem [shape: f32[1,64], index: 6, kind: input, shape index: {}]   ;;  %s799_s7 = inlined_call_operand.hbm [shape: f32[64,64], index: 7, kind: input, shape index: {}]   ;;  %s800_s8 = inlined_call_operand.vmem [shape: f32[1,64], index: 8, kind: input, shape index: {}]   ;;  %s801_s9 = inlined_call_operand.hbm [shape: f32[64,64], index: 9, kind: input, shape index: {}]   ;;  %s802_s10 = inlined_call_operand.vmem [shape: f32[1,64], index: 10, kind: input, shape index: {}]   ;;  %s803_s11 = inlined_call_operand.vmem [shape: f32[1,64], index: 11, kind: input, shape index: {}]   ;;  %s804_s13 = inlined_call_operand.hbm [shape: f32[1,8], index: 13, kind: output, shape index: {0}]   ;;  %s805_s14 = inlined_call_operand.hbm [shape: f32[1,8], index: 14, kind: output, shape index: {1}]   ;;  %s806_s12 = inlined_call_operand.<no memory space> [shape: f32[1,1], index: 12, kind: input, shape index: {}]  }
   0x1   :  { %v20_v0 = vstv %s796_s4  ;;  %v22_v1 = vstv %s806_s12 }
   0x2   :  { %21 = vst [vmem:[#allocation2] sm:$0x1] %v20_v0 }
   0x3   :  { %23 = vst [vmem:[#allocation3] sm:$0x1] %v22_v1 }
   0x4   :  { %24 = vsyncpa [#allocation5], 0 }
   0x5   :  { %25 = vsyncpa [#allocation8], 0 }
   0x6   :  { %26 = vsyncpa [#allocation11], 0 }
   0x7   :  { %27 = vsyncpa [#allocation6], 0  ;;  %s45_s19 = sshll.u32 %s793_s1, 4  ;;  %s46_s19 = int_to_ptr.hbm [resolvable:$true] %s45_s19 }
   0x8   :  { %28 = vsyncpa [#allocation15], 0  ;;  %s638_s20 = smov [#allocation7]   ;;  %s76_s12 = sshll.u32 %s799_s7, 4  ;;  %s77_s12 = int_to_ptr.hbm [resolvable:$true] %s76_s12 }
   0x9   :  { %s47_s21 = sshll.u32 %s638_s20, 4  ;;  %s639_s23 = smov [#allocation10]   ;;  %s48_s21 = int_to_ptr.vmem [resolvable:$true] %s47_s21 }
   0xa   :  { %50 = dma.hbm_to_vmem [thread:$0]  %s46_s19, 128, %s48_s21, [#allocation8]  }
   0xb   :  { %s78_s24 = sshll.u32 %s639_s23, 4  ;;  %s34_s27 = sshll.u32 %s792_s0, 4  ;;  %s79_s24 = int_to_ptr.vmem [resolvable:$true] %s78_s24  ;;  %s35_s27 = int_to_ptr.hbm [resolvable:$true] %s34_s27 }
   0xc   :  { %s640_s1 = smov 128   ;;  %s641_s28 = smov 8  }
   0xd   :  { %84 = dma.hbm_to_vmem [thread:$0]  %s77_s12, 1024, %s79_s24, [#allocation11], %s640_s1, %s640_s1, %s641_s28  }
   0xe   :  { %s61_s15 = sshll.u32 %s797_s5, 4  ;;  %s642_s16 = smov [#allocation4]   ;;  %s62_s15 = int_to_ptr.hbm [resolvable:$true] %s61_s15 }
   0xf   :  { %s36_s17 = sshll.u32 %s642_s16, 4  ;;  %s643_s7 = smov [#allocation9]   ;;  %s37_s17 = int_to_ptr.vmem [resolvable:$true] %s36_s17 }
  0x10   :  { %39 = dma.hbm_to_vmem [thread:$0]  %s35_s27, 128, %s37_s17, [#allocation5]  }
  0x11   :  { %s63_s18 = sshll.u32 %s643_s7, 4  ;;  %s91_s0 = sshll.u32 %s801_s9, 4  ;;  %s64_s18 = int_to_ptr.vmem [resolvable:$true] %s63_s18  ;;  %s92_s0 = int_to_ptr.hbm [resolvable:$true] %s91_s0 }
  0x12   :  { %69 = dma.hbm_to_vmem [thread:$0]  %s62_s15, 768, %s64_s18, [#allocation8], %s640_s1, %s640_s1, %s641_s28  }
  0x13   :  { %s644_s21 = smov [#allocation12]  }
  0x14   :  { %s93_s4 = sshll.u32 %s644_s21, 4  ;;  %s94_s4 = int_to_ptr.vmem [resolvable:$true] %s93_s4 }
  0x15   :  { %99 = dma.hbm_to_vmem [thread:$0]  %s92_s0, 1024, %s94_s4, [#allocation11], %s640_s1, %s640_s1, %s641_s28  }
  0x16   :  { %628 = dma.done.wait [#allocation5], 128  }
  0x17   :  { %629 = vsyncadd [#allocation5], 4294967168 }
  0x18   :  { %630 = dma.done.wait [#allocation8], 896  }
  0x19   :  { %631 = vsyncadd [#allocation8], 4294966400 }
  0x1a   :  { %632 = dma.done.wait [#allocation11], 2048  }
  0x1b   :  { %633 = vsyncadd [#allocation11], 4294965248  ;;  %vm190_vm0 = vcmask 1042432   ;;  %v182_v2 = vld [vmem:[#allocation9 + $0x28] sm:$0x7]  ;;  %v181_v3 = vld [vmem:[#allocation9 + $0x20] sm:$0xff]  ;;  %v322_v63 = vlaneseq }
  0x1c   :  { %421 = vmatpush.msk.msra.mxu0 %vm190_vm0, %v182_v2  ;;  %v180_v4 = vld [vmem:[#allocation9 + $0x18] sm:$0xff]  ;;  %v222_v5 = vld [vmem:[#allocation10 + $0x38] sm:$0xff]  ;;  %v221_v6 = vld [vmem:[#allocation10 + $0x30] sm:$0xff]  ;;  %vm187_vm1 = vcmask 351232   ;;  %vm227_vm2 = vcmask 523264   ;;  %s645_s22 = smov 118  }
  0x1d   :  { %v179_v7 = vld [vmem:[#allocation9 + $0x10] sm:$0xff]  ;;  %239 = vmatpush.msra.mxu1 %v222_v5  ;;  %v220_v8 = vld [vmem:[#allocation10 + $0x28] sm:$0xff]  ;;  %v178_v9 = vld [vmem:[#allocation9 + $0x8] sm:$0xff]  ;;  %s646_s12 = smov 108   ;;  %s647_s23 = smov 98   ;;  %vm169_vm3 = vcmask 56320  }
  0x1e   :  { %205 = vmatpush.msra.mxu0 %v181_v3  ;;  %v219_v10 = vld [vmem:[#allocation10 + $0x20] sm:$0xff]  ;;  %v177_v11 = vld [vmem:[#allocation9] sm:$0xff]  ;;  %v218_v12 = vld [vmem:[#allocation10 + $0x18] sm:$0xff]  ;;  %vm158_vm4 = vcmask 80896   ;;  %v648_v62 = vmov 0   ;;  %v364_v0 = vshrl.u32 %v322_v63, 7 }
  0x1f   :  { %240 = vmatpush.msra.mxu1 %v221_v6  ;;  %v126_v13 = vld [vmem:[#allocation4] sm:$0xff]  ;;  %v217_v14 = vld [vmem:[#allocation10 + $0x10] sm:$0xff]  ;;  %v216_v15 = vld [vmem:[#allocation10 + $0x8] sm:$0xff]  ;;  %443 = vset.pattern.permute.xlu2 %v648_v62  ;;  %vm326_vm9 = vcmask 57344   ;;  %s393_s16 = sshll.u32 %s804_s13, 4  ;;  %s650_s7 = smov [#allocation14]   ;;  %s394_s16 = int_to_ptr.hbm [resolvable:$true] %s393_s16 }
  0x20   :  { %206 = vmatpush.msra.mxu0 %v180_v4  ;;  %v215_v16 = vld [vmem:[#allocation10] sm:$0xff]  ;;  %v259_v17 = vld [vmem:[#allocation12 + $0x38] sm:$0xff]  ;;  %v258_v18 = vld [vmem:[#allocation12 + $0x30] sm:$0xff]  ;;  %131 = vrot.lane.b32.xlu0 %v126_v13, %s645_s22  ;;  %v128_v29 = vmul.f32 %v126_v13, %v126_v13  ;;  %s402_s18 = sshll.u32 %s650_s7, 4  ;;  %s404_s0 = sshll.u32 %s805_s14, 4  ;;  %s403_s18 = int_to_ptr.vmem [resolvable:$true] %s402_s18  ;;  %s405_s0 = int_to_ptr.hbm [resolvable:$true] %s404_s0 }
  0x21   :  { %241 = vmatpush.msra.mxu1 %v220_v8  ;;  %275 = vmatpush.msra.mxu2 %v259_v17  ;;  %v257_v19 = vld [vmem:[#allocation12 + $0x28] sm:$0xff]  ;;  %v256_v20 = vld [vmem:[#allocation12 + $0x20] sm:$0xff]  ;;  %v255_v21 = vld [vmem:[#allocation12 + $0x18] sm:$0xff] }
  0x22   :  { %207 = vmatpush.msra.mxu0 %v179_v7  ;;  %v447_v22 = vld [vmem:[%s798_s6] ss:$0 sm:$0xff]  ;;  %140 = vrot.lane.b32.xlu1 %v126_v13, %s646_s12  ;;  %v253_v27 = vld [vmem:[#allocation12 + $0x8] sm:$0xff]  ;;  %v252_v28 = vld [vmem:[#allocation12] sm:$0xff] }
  0x23   :  { %242 = vmatpush.msra.mxu1 %v219_v10  ;;  %276 = vmatpush.msra.mxu2 %v258_v18  ;;  %v254_v26 = vld [vmem:[#allocation12 + $0x10] sm:$0xff]  ;;  %v163_v48 = vld [vmem:[#allocation7] sm:$0xff]  ;;  %v173_v53 = vld [vmem:[#allocation2] sm:$0x1] }
  0x24   :  { %208 = vmatpush.msra.mxu0 %v178_v9  ;;  %148 = vrot.lane.b32.xlu2 %v126_v13, %s647_s23  ;;  %v448_v30 = vld [vmem:[%s800_s8] ss:$0 sm:$0xff]  ;;  %v296_v54 = vld [vmem:[#allocation3] sm:$0x1]  ;;  %426 = vpush %v173_v53 }
  0x25   :  { %243 = vmatpush.msra.mxu1 %v218_v12  ;;  %277 = vmatpush.msra.mxu2 %v257_v19  ;;  %v450_v47 = vld [vmem:[%s795_s3] ss:$0 sm:$0xff]  ;;  %428 = vpush %v296_v54 }
  0x26   :  { %209 = vmatpush.msra.mxu0 %v177_v11  ;;  %v168_v49 = vmul.f32 %v450_v47, %v163_v48  ;;  %v449_v55 = vld [vmem:[%s802_s10] ss:$0 sm:$0xff]  ;;  %445 = vset.pattern.permute.xlu1 %v648_v62 }
  0x27   :  { %422 = vmatmul.msk.f32.vlgmr.msra.gmra.mxu0 %vm187_vm1, %v126_v13  ;;  %244 = vmatpush.msra.mxu1 %v217_v14  ;;  %v451_v58 = vld [vmem:[%s803_s11] ss:$0 sm:$0xff] }
  0x28   :  { %278 = vmatpush.msra.mxu2 %v256_v20  ;;  %136 = vrot.lane.b32.xlu0 %v128_v29, %s645_s22  ;;  %v170_v51 = vsel %vm169_vm3, %v168_v49, 0.0 }
  0x29   :  { %245 = vmatpush.msra.mxu1 %v216_v15  ;;  %444 = vset.pattern.permute.xlu0 %v364_v0 }
  0x2a   :  { %279 = vmatpush.msra.mxu2 %v255_v21  ;;  %144 = vrot.lane.b32.xlu1 %v128_v29, %s646_s12 }
  0x2b   :  { %246 = vmatpush.msra.mxu1 %v215_v16 }
  0x2c   :  { %280 = vmatpush.msra.mxu2 %v254_v26  ;;  %152 = vrot.lane.b32.xlu2 %v128_v29, %s647_s23 }
  0x2e   :  { %281 = vmatpush.msra.mxu2 %v253_v27 }
  0x30   :  { %282 = vmatpush.msra.mxu2 %v252_v28 }
  0x54   :  { %171 = vadd.xlane.f32.xlu1 %v170_v51 }
  0x55   :  { %s427_s28 = spop %426 }
  0x56   :  { %v175_v1 = vstv %s427_s28  ;;  %s429_s10 = spop %428 }
  0x57   :  { %v298_v6 = vstv %s429_s10 }
  0x7e   :  { %v149_v36 = vpop.permute.xlu2 %148 }
  0x86   :  { %v153_v44 = vpop.permute.xlu2 %152 }
  0x92   :  { %v132_v34 = vpop.permute.xlu0 %131 }
  0x93   :  { %v134_v37 = vadd.f32 %v132_v34, %v126_v13 }
  0x94   :  { %v141_v35 = vpop.permute.xlu1 %140 }
  0x95   :  { %v143_v38 = vadd.f32 %v141_v35, %v134_v37  ;;  %v328_v35 = vld [vmem:[%s794_s2] sm:$0x1]  ;;  %s649_s2 = smov [#allocation13]  }
  0x96   :  { %s391_s17 = sshll.u32 %s649_s2, 4  ;;  %s392_s17 = int_to_ptr.vmem [resolvable:$true] %s391_s17 }
  0x97   :  { %v151_v42 = vadd.f32 %v149_v36, %v143_v38 }
  0x99   :  { %v156_v45 = vmul.f32 %v151_v42, %v151_v42 }
  0x9a   :  { %v137_v39 = vpop.permute.xlu0 %136 }
  0x9b   :  { %v139_v40 = vadd.f32 %v137_v39, %v128_v29  ;;  %v323_v29 = vand.u32 127, %v322_v63 }
  0x9c   :  { %v145_v41 = vpop.permute.xlu1 %144 }
  0x9d   :  { %v147_v43 = vadd.f32 %v145_v41, %v139_v40 }
  0x9f   :  { %v155_v46 = vadd.f32 %v153_v44, %v147_v43 }
  0xa1   :  { %v157_v50 = vsub.f32 %v156_v45, %v155_v46 }
  0xa3   :  { %v159_v52 = vsel %vm158_vm4, %v157_v50, 0.0 }
  0xa4   :  { %v211_v23 = vpop.f32.mrf.mxu0  ;;  %160 = vadd.xlane.f32.xlu0 %v159_v52 }
  0xa5   :  { %v212_v24 = vadd.f32 %v447_v22, %v211_v23 }
  0xa7   :  { %v214_v25 = vmax.f32 %v212_v24, 0.0 }
  0xa9   :  { %423 = vmatmul.msk.f32.vlgmr.msra.gmra.mxu1 %vm227_vm2, %v214_v25 }
  0xc7   :  { %v172_v2 = vpop.xlane.xlu1 %171 }
  0xc8   :  { %v176_v4 = vadd.f32 %v175_v1, %v172_v2 }
 0x117   :  { %v161_v3 = vpop.xlane.xlu0 %160 }
 0x118   :  { %v162_v5 = vmul.f32 0.5, %v161_v3 }
 0x11a   :  { %v300_v8 = vadd.f32 %v176_v4, %v162_v5 }
 0x126   :  { %v248_v31 = vpop.f32.mrf.mxu1 }
 0x127   :  { %v249_v32 = vadd.f32 %v448_v30, %v248_v31 }
 0x129   :  { %v251_v33 = vmax.f32 %v249_v32, 0.0 }
 0x12b   :  { %424 = vmatmul.msk.f32.vlgmr.msra.gmra.mxu2 %vm227_vm2, %v251_v33 }
 0x1ae   :  { %v284_v56 = vpop.f32.mrf.mxu2 }
 0x1af   :  { %v285_v57 = vadd.f32 %v449_v55, %v284_v56 }
 0x1b1   :  { %v287_v59 = vmax.f32 %v285_v57, 0.0 }
 0x1b3   :  { %v292_v60 = vmul.f32 %v451_v58, %v287_v59 }
 0x1b5   :  { %v293_v61 = vsel %vm227_vm2, %v292_v60, 0.0 }
 0x1b6   :  { %294 = vadd.xlane.f32.xlu2 %v293_v61 }
 0x229   :  { %v295_v7 = vpop.xlane.xlu2 %294 }
 0x22a   :  { %v299_v9 = vadd.f32 %v298_v6, %v295_v7 }
 0x22c   :  { %v767_v10 = vadd.f32 %v300_v8, %v299_v9 }
 0x22e   :  { %v331_v11 = vperm.slane %v767_v10, 0  ;;  %v332_v12 = vperm.slane %v767_v10, 1  ;;  %v333_v13 = vperm.slane %v767_v10, 2  ;;  %v334_v14 = vperm.slane %v767_v10, 3 }
 0x22f   :  { %v335_v15 = vperm.slane %v767_v10, 4  ;;  %v336_v16 = vperm.slane %v767_v10, 5  ;;  %v425_v17 = vmul.f32 -1.442695, %v767_v10  ;;  %v337_v18 = vperm.slane %v767_v10, 6 }
 0x230   :  { %339 = vst [vmem:[#allocation1] ss:$9 sm:$0xff] %v331_v11  ;;  %v338_v19 = vperm.slane %v767_v10, 7  ;;  %v371_v40 = vand.u32 2147483647, %v767_v10  ;;  %v329_v46 = vmax.f32 %v767_v10, 0.0 }
 0x231   :  { %341 = vst [vmem:[#allocation1 + $0x1] ss:$9 sm:$0xff] %v332_v12  ;;  %452 = vpow2.f32 %v425_v17 }
 0x232   :  { %343 = vst [vmem:[#allocation1 + $0x2] ss:$9 sm:$0xff] %v333_v13  ;;  %v372_v41 = vsub.f32 0.0, %v371_v40 }
 0x233   :  { %345 = vst [vmem:[#allocation1 + $0x3] ss:$9 sm:$0xff] %v334_v14 }
 0x234   :  { %347 = vst [vmem:[#allocation1 + $0x4] ss:$9 sm:$0xff] %v335_v15  ;;  %v373_v42 = vmul.f32 1.442695, %v372_v41 }
 0x235   :  { %349 = vst [vmem:[#allocation1 + $0x5] ss:$9 sm:$0xff] %v336_v16 }
 0x236   :  { %351 = vst [vmem:[#allocation1 + $0x6] ss:$9 sm:$0xff] %v337_v18 }
 0x237   :  { %353 = vst [vmem:[#allocation1 + $0x7] ss:$9 sm:$0xff] %v338_v19  ;;  %v453_v20 = vpop.eup %452 }
 0x238   :  { %v305_v21 = vadd.f32 1.0, %v453_v20 }
 0x23a   :  { %454 = vrcp.f32 %v305_v21  ;;  %v317_v26 = vand.u32 2147483648, %v305_v21  ;;  %v315_v28 = vand.u32 2147483647, %v305_v21  ;;  %vm311_vm6 = vweird.f32 %v305_v21 }
 0x23b   :  { %456 = vpow2.f32 %v373_v42 }
 0x23c   :  { %v318_v31 = vor.u32 1.1754944e-38, %v317_v26  ;;  %vm316_vm8 = vcmp.eq.f32.partialorder %v315_v28, 8.507059e+37 }
 0x23e   :  { %v354_v22 = vld [vmem:[#allocation1] sm:$0xff] }
 0x23f   :  { %356 = vperm.xlu2 %443, %v354_v22  }
 0x240   :  { %v455_v23 = vpop.eup %454 }
 0x241   :  { %v307_v24 = vmul.f32 %v455_v23, %v305_v21  ;;  %vm312_vm5 = vweird.f32 %v455_v23  ;;  %v457_v43 = vpop.eup %456 }
 0x242   :  { %vm313_vm7 = vmor %vm311_vm6, %vm312_vm5  ;;  %v375_v44 = vadd.f32 1.0, %v457_v43 }
 0x243   :  { %v308_v25 = vsub.f32 1.0, %v307_v24 }
 0x244   :  { %458 = vlog2.f32 %v375_v44 }
 0x245   :  { %v309_v27 = vmul.f32 %v455_v23, %v308_v25 }
 0x247   :  { %v310_v30 = vadd.f32 %v455_v23, %v309_v27 }
 0x249   :  { %v314_v32 = vsel %vm313_vm7, %v455_v23, %v310_v30 }
 0x24a   :  { %v319_v33 = vsel %vm316_vm8, %v318_v31, %v314_v32  ;;  %v459_v45 = vpop.eup %458 }
 0x24b   :  { %v324_v34 = vperm.slane %v319_v33, %v323_v29  ;;  %v377_v48 = vmul.f32 0.6931472, %v459_v45 }
 0x24d   :  { %327 = vst.msk [vmem:[#allocation13] sm:$0x1] %vm326_vm9, %v324_v34 }
 0x24e   :  { %396 = dma.vmem_to_hbm [thread:$0]  %s392_s17, 16, %s394_s16, [#allocation6]  }
 0x299   :  { %v357_v36 = vpop.permute.xlu2 %356 }
 0x29a   :  { %v358_v37 = vperm.slane %v357_v36, %v323_v29 }
 0x29c   :  { %v360_v38 = vmul.f32 %v358_v37, %v328_v35 }
 0x29e   :  { %v362_v39 = vperm.slane %v360_v38, 0 }
 0x2a0   :  { %367 = vperm.xlu0 %444, %v362_v39  }
 0x2a8   :  { %446 = vset.pattern.permute.xlu0 %v648_v62 }
 0x312   :  { %v368_v47 = vpop.permute.xlu0 %367 }
 0x313   :  { %v370_v49 = vsub.f32 %v329_v46, %v368_v47 }
 0x315   :  { %v378_v50 = vadd.f32 %v377_v48, %v370_v49 }
 0x317   :  { %381 = vperm.xlu1 %445, %v378_v50  }
 0x389   :  { %v382_v51 = vpop.permute.xlu1 %381 }
 0x38a   :  { %v383_v52 = vperm.slane %v382_v51, %v323_v29 }
 0x38c   :  { %385 = vst.msk [vmem:[#allocation14] sm:$0x1] %vm326_vm9, %v383_v52 }
 0x38d   :  { %407 = dma.vmem_to_hbm [thread:$0]  %s403_s18, 16, %s405_s0, [#allocation15]  }
 0x38e   :  { %634 = dma.done.wait [#allocation6], 16  }
 0x38f   :  { %635 = vsyncadd [#allocation6], 4294967280 }
 0x390   :  { %636 = dma.done.wait [#allocation15], 16  }
 0x391   :  { %637 = vsyncadd [#allocation15], 4294967280 }
 0x392   :  { %416 = vsyncpa [#allocation5], 1 }
 0x393   :  { %417 = vsyncpa [#allocation8], 1 }
 0x394   :  { %418 = vsyncpa [#allocation11], 1 }
 0x395   :  { %419 = vsyncpa [#allocation6], 1 }
 0x396   :  { %420 = vsyncpa [#allocation15], 1 }

</bundles_post_ra>
